<compile_context>
chip_gen: v5e
topology: v5e:2x2
jax: 0.10.0
libtpu: 0.0.40
codegen_flags: <defaults>
</compile_context>

<pallas_src>
import jax
import jax.numpy as jnp
from jax.experimental import pallas as pl
from jax.experimental.pallas import tpu as pltpu


# ----------------------------------------------------------------------------
# Kernel helpers
# ----------------------------------------------------------------------------
def _channel_matmul(w, x, unroll_threshold=32):
    """1x1-conv as channel contraction:  w:(Co,Ci) @ x:(nb,Ci,L) -> (nb,Co,L).

    For small Ci (the F=4 / 2F=8 case) use an unrolled VPU broadcast-FMA so we
    never touch the MXU with a tiny contraction dim; for large Ci use the MXU.
    Inputs are expected in float32.
    """
    Co, Ci = w.shape
    if Ci <= unroll_threshold:
        acc = w[:, 0:1][None] * x[:, 0:1, :]          # (nb, Co, L)
        for k in range(1, Ci):                        # static unroll
            acc = acc + w[:, k:k + 1][None] * x[:, k:k + 1, :]
        return acc
    return jnp.einsum('ok,bkl->bol', w, x, preferred_element_type=jnp.float32)


def _global_gate_fused_kernel(x_ref, w1_ref, wm_ref, b1bm_ref, w2_ref, b2_ref,
                              o_ref):
    """Fused path: full spatial extent resident -> mean path computed in-kernel.

    x_ref / o_ref : (2, nb, F, HW)   real/imag fused, nb batch rows per step.
    """
    xr = x_ref[0].astype(jnp.float32)                 # (nb, F, HW)
    xi = x_ref[1].astype(jnp.float32)

    # magnitude over the complex axis
    mag = jnp.sqrt(xr * xr + xi * xi)                 # (nb, F, HW)

    # global spatial means (HW fully resident in this block -> exact mean)
    mr = jnp.mean(xr, axis=-1, keepdims=True)         # (nb, F, 1)
    mi = jnp.mean(xi, axis=-1, keepdims=True)
    mean_mag = jnp.sqrt(mr * mr + mi * mi)            # (nb, F, 1)

    # mean_mat Linear (F -> 2F); conv1 bias b1 is folded into b1bm.
    wm = wm_ref[...].astype(jnp.float32)
    gm = _channel_matmul(wm, mean_mag) + b1bm_ref[...][None]     # (nb, 2F, 1)

    # conv1 (1x1) + g_m, relu
    w1 = w1_ref[...].astype(jnp.float32)
    g = _channel_matmul(w1, mag) + gm                 # (nb, 2F, HW)
    g = jnp.maximum(g, 0.0)

    # conv2 (1x1) + bias, sigmoid
    w2 = w2_ref[...].astype(jnp.float32)
    gate = jax.nn.sigmoid(_channel_matmul(w2, g) + b2_ref[...][None])  # (nb,F,HW)

    # Re-read x from VMEM (plentiful vld slots) so xr/xi need not stay live
    # across the whole gate computation.
    o_ref[0] = (x_ref[0].astype(jnp.float32) * gate).astype(o_ref.dtype)
    o_ref[1] = (x_ref[1].astype(jnp.float32) * gate).astype(o_ref.dtype)


def _global_gate_tiled_kernel(x_ref, w1_ref, gm_ref, w2_ref, b2_ref, o_ref):
    """Fallback path for very large HW: g_m precomputed in the wrapper.

    x_ref / o_ref : (2, 1, F, tHW),  gm_ref : (1, 2F, 1) (contains b1 + bm).
    """
    xr = x_ref[0].astype(jnp.float32)                 # (1, F, tHW)
    xi = x_ref[1].astype(jnp.float32)
    mag = jnp.sqrt(xr * xr + xi * xi)

    w1 = w1_ref[...].astype(jnp.float32)
    g = _channel_matmul(w1, mag) + gm_ref[...]        # (1, 2F, tHW)
    g = jnp.maximum(g, 0.0)

    w2 = w2_ref[...].astype(jnp.float32)
    gate = jax.nn.sigmoid(_channel_matmul(w2, g) + b2_ref[...][None])

    o_ref[0] = (x_ref[0].astype(jnp.float32) * gate).astype(o_ref.dtype)
    o_ref[1] = (x_ref[1].astype(jnp.float32) * gate).astype(o_ref.dtype)


# ----------------------------------------------------------------------------
# Wrapper helpers
# ----------------------------------------------------------------------------
def _vmem_capacity_bytes():
    """Per-TensorCore VMEM capacity; conservative (v7x) fallback off-TPU."""
    try:
        info = pltpu.get_tpu_info()
        cap = getattr(info, "vmem_capacity_bytes", None)
        if cap:
            return int(cap)
    except Exception:
        pass
    return 64 * 2 ** 20


def _largest_divisor_leq(n, cap):
    cap = max(1, min(n, cap))
    for d in range(cap, 0, -1):
        if n % d == 0:
            return d
    return 1


def _choose_hw_tile(HW, F, itemsize, budget_bytes):
    """Largest lane tile dividing HW under the per-step VMEM budget; prefers
    multiples of 128 (unmasked stores, aligned DMA)."""
    # per lane column: in+out fused blocks, double-buffered, + f32 temporaries
    per_lane = 4 * 2 * F * itemsize + 6 * F * 4
    cap = max(1, budget_bytes // per_lane)
    if HW <= cap:
        return HW
    t = (min(cap, HW) // 128) * 128
    while t >= 128:
        if HW % t == 0:
            return t
        t -= 128
    # TODO(synk): no 128-aligned divisor of HW fits the budget; an unaligned
    # divisor means masked vst stores -- correct but not the fast path.
    for t in range(min(cap, HW), 0, -1):
        if HW % t == 0:
            return t
    return HW


def global_gate(x, w1, b1, wm, bm, w2, b2):
    """x: [2, B, F, H, W]. Returns [2, B, F, H, W]."""
    two, B, F, H, W = x.shape
    assert two == 2
    HW = H * W
    F2 = 2 * F
    itemsize = x.dtype.itemsize

    # Free reshape (contiguous): spatial flattened onto the lane axis.
    xf = x.reshape(2, B, F, HW)

    # ---- generation-aware VMEM budgets --------------------------------------
    vmem_cap = _vmem_capacity_bytes()
    tile_budget = (vmem_cap * 3) // 8        # ~24 MiB v7x, ~48 MiB v5e/v6e
    vmem_limit = (vmem_cap * 3) // 4         # headroom for Mosaic scratch
    vmem_limit = max(vmem_limit, 16 * 2 ** 20)

    # Per-batch footprint if the whole (2, F, HW) slab lives in one block:
    # in + out blocks (double-buffered) plus f32 intermediates (xr/xi, mag, g, gate).
    per_batch = 2 * (2 * F * HW * itemsize) * 2 + 8 * F * HW * 4
    weights_b = (2 * F2 * F + F * F2 + F2 + F) * 4
    fused = (per_batch + weights_b) <= tile_budget

    b1bm = (b1.astype(jnp.float32) + bm.astype(jnp.float32)).reshape(F2, 1)
    b2c = b2.astype(jnp.float32).reshape(F, 1)

    if fused:
        # ---- fused-mean fast path: grid over batch rows only ---------------
        nb_cap = max(1, int(tile_budget // per_batch))
        if B >= 2:
            nb_cap = min(nb_cap, B // 2)     # >= 2 grid blocks for v7x megacore
        nb = _largest_divisor_leq(B, nb_cap)

        grid_spec = pltpu.PrefetchScalarGridSpec(
            num_scalar_prefetch=0,
            grid=(B // nb,),
            in_specs=[
                pl.BlockSpec((2, nb, F, HW), lambda b: (0, b, 0, 0)),  # x (fused)
                pl.BlockSpec((F2, F), lambda b: (0, 0)),               # conv1 w
                pl.BlockSpec((F2, F), lambda b: (0, 0)),               # mean_mat w
                pl.BlockSpec((F2, 1), lambda b: (0, 0)),               # b1 + bm
                pl.BlockSpec((F, F2), lambda b: (0, 0)),               # conv2 w
                pl.BlockSpec((F, 1), lambda b: (0, 0)),                # conv2 bias
            ],
            out_specs=pl.BlockSpec((2, nb, F, HW), lambda b: (0, b, 0, 0)),
        )
        out = pl.pallas_call(
            _global_gate_fused_kernel,
            out_shape=jax.ShapeDtypeStruct((2, B, F, HW), x.dtype),
            grid_spec=grid_spec,
            compiler_params=pltpu.CompilerParams(
                dimension_semantics=("parallel",),
                vmem_limit_bytes=int(vmem_limit),
            ),
        )(xf, w1, wm, b1bm, w2, b2c)
    else:
        # ---- fallback for very large HW: decoupled global statistics -------
        # (one extra read of x by the XLA reduction; only taken when a full
        # per-batch slab cannot fit VMEM)
        means = jnp.mean(xf.astype(jnp.float32), axis=-1)            # (2, B, F)
        mean_mag = jnp.sqrt(means[0] ** 2 + means[1] ** 2)           # (B, F)
        g_m = mean_mag @ wm.T.astype(jnp.float32) + (b1 + bm).astype(jnp.float32)
        g_m = g_m.reshape(B, F2, 1).astype(jnp.float32)

        tHW = _choose_hw_tile(HW, F, itemsize, tile_budget)
        n_hw = HW // tHW

        grid_spec = pltpu.PrefetchScalarGridSpec(
            num_scalar_prefetch=0,
            grid=(B, n_hw),
            in_specs=[
                pl.BlockSpec((2, 1, F, tHW), lambda b, j: (0, b, 0, j)),  # x
                pl.BlockSpec((F2, F), lambda b, j: (0, 0)),               # conv1 w
                pl.BlockSpec((1, F2, 1), lambda b, j: (b, 0, 0)),         # g_m(+b1+bm)
                pl.BlockSpec((F, F2), lambda b, j: (0, 0)),               # conv2 w
                pl.BlockSpec((F, 1), lambda b, j: (0, 0)),                # conv2 bias
            ],
            out_specs=pl.BlockSpec((2, 1, F, tHW), lambda b, j: (0, b, 0, j)),
        )
        out = pl.pallas_call(
            _global_gate_tiled_kernel,
            out_shape=jax.ShapeDtypeStruct((2, B, F, HW), x.dtype),
            grid_spec=grid_spec,
            compiler_params=pltpu.CompilerParams(
                dimension_semantics=("parallel", "parallel"),
                vmem_limit_bytes=int(vmem_limit),
            ),
        )(xf, w1, g_m, w2, b2c)

    return out.reshape(2, B, F, H, W)


def global_gate_reference(x, w1, b1, wm, bm, w2, b2):
    """Pure-JAX reference mirroring the PyTorch forward."""
    two, B, F, H, W = x.shape
    mag = jnp.sqrt(x[0] ** 2 + x[1] ** 2)                      # (B,F,H,W)
    g_x = jnp.einsum('of,bfhw->bohw', w1, mag) + b1[None, :, None, None]
    means = x.reshape(2, B, F, -1).mean(axis=3)                # (2,B,F)
    mean_mag = jnp.sqrt(means[0] ** 2 + means[1] ** 2)         # (B,F)
    g_m = mean_mag @ wm.T + bm                                 # (B,2F)
    g = jax.nn.relu(g_x + g_m[:, :, None, None])
    g = jnp.einsum('of,bfhw->bohw', w2, g) + b2[None, :, None, None]
    g = jax.nn.sigmoid(g)
    return x * g[None]


if __name__ == "__main__":
    # repr=(2, 2) -> total_fmaps F = 4, dim = 2
    B, F, H, W = 2, 4, 16, 16
    F2 = 2 * F

    key = jax.random.PRNGKey(0)
    kx, k1, k2, k3, k4, k5, k6 = jax.random.split(key, 7)

    x = jax.random.normal(kx, (2, B, F, H, W), dtype=jnp.float32)

    # Deterministic parameter init (PyTorch-style uniform(+-1/sqrt(fan_in))).
    def uinit(k, shape, fan_in):
        bound = 1.0 / jnp.sqrt(fan_in)
        return jax.random.uniform(k, shape, jnp.float32, -bound, bound)

    w1 = uinit(k1, (F2, F), F)      # conv1 1x1 weight (squeezed kernel dims)
    b1 = uinit(k2, (F2,), F)
    wm = uinit(k3, (F2, F), F)      # mean_mat (Linear) weight
    bm = uinit(k4, (F2,), F)
    w2 = uinit(k5, (F, F2), F2)     # conv2 1x1 weight
    b2 = uinit(k6, (F,), F2)

    out = global_gate(x, w1, b1, wm, bm, w2, b2)
    out = jax.block_until_ready(out)

    ref = global_gate_reference(x, w1, b1, wm, bm, w2, b2)
    assert out.shape == (2, B, F, H, W)
    assert jnp.allclose(out, ref, atol=1e-5, rtol=1e-5), "mismatch vs reference"

    print("KERNEL_OK")
</pallas_src>

<mosaic_0001>
module attributes {stable_mosaic.version = 11 : i64} {
  func.func @_global_gate_fused_kernel(%arg0: i32, %arg1: memref<2x1x4x256xf32, #tpu.memory_space<vmem>>, %arg2: memref<8x4xf32, #tpu.memory_space<vmem>>, %arg3: memref<8x4xf32, #tpu.memory_space<vmem>>, %arg4: memref<8x1xf32, #tpu.memory_space<vmem>>, %arg5: memref<4x8xf32, #tpu.memory_space<vmem>>, %arg6: memref<4x1xf32, #tpu.memory_space<vmem>>, %arg7: memref<2x1x4x256xf32, #tpu.memory_space<vmem>>) attributes {dimension_semantics = [#tpu.dimension_semantics<parallel>], iteration_bounds = array<i64: 2>, scalar_prefetch = 0 : i64, scratch_operands = 0 : i64, tpu.core_type = #tpu.core_type<tc>, window_params = [{transform_indices = @transform_0, window_bounds = array<i64: 2, 1, 4, 256>}, {pipeline_mode = #tpu.pipeline_mode<synchronous>, transform_indices = @transform_1, window_bounds = array<i64: 8, 4>}, {pipeline_mode = #tpu.pipeline_mode<synchronous>, transform_indices = @transform_2, window_bounds = array<i64: 8, 4>}, {pipeline_mode = #tpu.pipeline_mode<synchronous>, transform_indices = @transform_3, window_bounds = array<i64: 8, 1>}, {pipeline_mode = #tpu.pipeline_mode<synchronous>, transform_indices = @transform_4, window_bounds = array<i64: 4, 8>}, {pipeline_mode = #tpu.pipeline_mode<synchronous>, transform_indices = @transform_5, window_bounds = array<i64: 4, 1>}, {transform_indices = @transform_6, window_bounds = array<i64: 2, 1, 4, 256>}]} {
    %c0 = arith.constant 0 : index
    %c0_0 = arith.constant 0 : index
    %c0_1 = arith.constant 0 : index
    %c0_2 = arith.constant 0 : index
    %0 = vector.load %arg1[%c0, %c0_0, %c0_1, %c0_2] : memref<2x1x4x256xf32, #tpu.memory_space<vmem>>, vector<1x1x4x256xf32>
    %1 = vector.shape_cast %0 : vector<1x1x4x256xf32> to vector<1x4x256xf32>
    %c1 = arith.constant 1 : index
    %c0_3 = arith.constant 0 : index
    %c0_4 = arith.constant 0 : index
    %c0_5 = arith.constant 0 : index
    %2 = vector.load %arg1[%c1, %c0_3, %c0_4, %c0_5] : memref<2x1x4x256xf32, #tpu.memory_space<vmem>>, vector<1x1x4x256xf32>
    %3 = vector.shape_cast %2 : vector<1x1x4x256xf32> to vector<1x4x256xf32>
    %4 = arith.mulf %1, %1 : vector<1x4x256xf32>
    %5 = arith.mulf %3, %3 : vector<1x4x256xf32>
    %6 = arith.addf %4, %5 : vector<1x4x256xf32>
    %7 = math.sqrt %6 : vector<1x4x256xf32>
    %cst = arith.constant dense<0.000000e+00> : vector<1x4xf32>
    %8 = vector.multi_reduction <add>, %1, %cst [2] : vector<1x4x256xf32> to vector<1x4xf32>
    %9 = vector.shape_cast %8 : vector<1x4xf32> to vector<1x4x1xf32>
    %cst_6 = arith.constant 2.560000e+02 : f32
    %10 = vector.broadcast %cst_6 : f32 to vector<1x4x1xf32>
    %11 = arith.divf %9, %10 : vector<1x4x1xf32>
    %cst_7 = arith.constant dense<0.000000e+00> : vector<1x4xf32>
    %12 = vector.multi_reduction <add>, %3, %cst_7 [2] : vector<1x4x256xf32> to vector<1x4xf32>
    %13 = vector.shape_cast %12 : vector<1x4xf32> to vector<1x4x1xf32>
    %cst_8 = arith.constant 2.560000e+02 : f32
    %14 = vector.broadcast %cst_8 : f32 to vector<1x4x1xf32>
    %15 = arith.divf %13, %14 : vector<1x4x1xf32>
    %16 = arith.mulf %11, %11 : vector<1x4x1xf32>
    %17 = arith.mulf %15, %15 : vector<1x4x1xf32>
    %18 = arith.addf %16, %17 : vector<1x4x1xf32>
    %19 = math.sqrt %18 : vector<1x4x1xf32>
    %c0_9 = arith.constant 0 : index
    %c0_10 = arith.constant 0 : index
    %20 = vector.load %arg3[%c0_9, %c0_10] : memref<8x4xf32, #tpu.memory_space<vmem>>, vector<8x4xf32>
    %21 = vector.extract_strided_slice %20 {offsets = [0, 0], sizes = [8, 1], strides = [1, 1]} : vector<8x4xf32> to vector<8x1xf32>
    %22 = vector.shape_cast %21 : vector<8x1xf32> to vector<1x8x1xf32>
    %23 = vector.extract_strided_slice %19 {offsets = [0, 0, 0], sizes = [1, 1, 1], strides = [1, 1, 1]} : vector<1x4x1xf32> to vector<1x1x1xf32>
    %24 = vector.broadcast %23 : vector<1x1x1xf32> to vector<1x8x1xf32>
    %25 = arith.mulf %22, %24 : vector<1x8x1xf32>
    %26 = vector.extract_strided_slice %20 {offsets = [0, 1], sizes = [8, 1], strides = [1, 1]} : vector<8x4xf32> to vector<8x1xf32>
    %27 = vector.shape_cast %26 : vector<8x1xf32> to vector<1x8x1xf32>
    %28 = vector.extract_strided_slice %19 {offsets = [0, 1, 0], sizes = [1, 1, 1], strides = [1, 1, 1]} : vector<1x4x1xf32> to vector<1x1x1xf32>
    %29 = vector.broadcast %28 : vector<1x1x1xf32> to vector<1x8x1xf32>
    %30 = arith.mulf %27, %29 : vector<1x8x1xf32>
    %31 = arith.addf %25, %30 : vector<1x8x1xf32>
    %32 = vector.extract_strided_slice %20 {offsets = [0, 2], sizes = [8, 1], strides = [1, 1]} : vector<8x4xf32> to vector<8x1xf32>
    %33 = vector.shape_cast %32 : vector<8x1xf32> to vector<1x8x1xf32>
    %34 = vector.extract_strided_slice %19 {offsets = [0, 2, 0], sizes = [1, 1, 1], strides = [1, 1, 1]} : vector<1x4x1xf32> to vector<1x1x1xf32>
    %35 = vector.broadcast %34 : vector<1x1x1xf32> to vector<1x8x1xf32>
    %36 = arith.mulf %33, %35 : vector<1x8x1xf32>
    %37 = arith.addf %31, %36 : vector<1x8x1xf32>
    %38 = vector.extract_strided_slice %20 {offsets = [0, 3], sizes = [8, 1], strides = [1, 1]} : vector<8x4xf32> to vector<8x1xf32>
    %39 = vector.shape_cast %38 : vector<8x1xf32> to vector<1x8x1xf32>
    %40 = vector.extract_strided_slice %19 {offsets = [0, 3, 0], sizes = [1, 1, 1], strides = [1, 1, 1]} : vector<1x4x1xf32> to vector<1x1x1xf32>
    %41 = vector.broadcast %40 : vector<1x1x1xf32> to vector<1x8x1xf32>
    %42 = arith.mulf %39, %41 : vector<1x8x1xf32>
    %43 = arith.addf %37, %42 : vector<1x8x1xf32>
    %c0_11 = arith.constant 0 : index
    %c0_12 = arith.constant 0 : index
    %44 = vector.load %arg4[%c0_11, %c0_12] : memref<8x1xf32, #tpu.memory_space<vmem>>, vector<8x1xf32>
    %45 = vector.shape_cast %44 : vector<8x1xf32> to vector<1x8x1xf32>
    %46 = arith.addf %43, %45 : vector<1x8x1xf32>
    %c0_13 = arith.constant 0 : index
    %c0_14 = arith.constant 0 : index
    %47 = vector.load %arg2[%c0_13, %c0_14] : memref<8x4xf32, #tpu.memory_space<vmem>>, vector<8x4xf32>
    %48 = vector.extract_strided_slice %47 {offsets = [0, 0], sizes = [8, 1], strides = [1, 1]} : vector<8x4xf32> to vector<8x1xf32>
    %49 = vector.shape_cast %48 : vector<8x1xf32> to vector<1x8x1xf32>
    %50 = vector.extract_strided_slice %7 {offsets = [0, 0, 0], sizes = [1, 1, 256], strides = [1, 1, 1]} : vector<1x4x256xf32> to vector<1x1x256xf32>
    %51 = vector.broadcast %49 : vector<1x8x1xf32> to vector<1x8x256xf32>
    %52 = vector.broadcast %50 : vector<1x1x256xf32> to vector<1x8x256xf32>
    %53 = arith.mulf %51, %52 : vector<1x8x256xf32>
    %54 = vector.extract_strided_slice %47 {offsets = [0, 1], sizes = [8, 1], strides = [1, 1]} : vector<8x4xf32> to vector<8x1xf32>
    %55 = vector.shape_cast %54 : vector<8x1xf32> to vector<1x8x1xf32>
    %56 = vector.extract_strided_slice %7 {offsets = [0, 1, 0], sizes = [1, 1, 256], strides = [1, 1, 1]} : vector<1x4x256xf32> to vector<1x1x256xf32>
    %57 = vector.broadcast %55 : vector<1x8x1xf32> to vector<1x8x256xf32>
    %58 = vector.broadcast %56 : vector<1x1x256xf32> to vector<1x8x256xf32>
    %59 = arith.mulf %57, %58 : vector<1x8x256xf32>
    %60 = arith.addf %53, %59 : vector<1x8x256xf32>
    %61 = vector.extract_strided_slice %47 {offsets = [0, 2], sizes = [8, 1], strides = [1, 1]} : vector<8x4xf32> to vector<8x1xf32>
    %62 = vector.shape_cast %61 : vector<8x1xf32> to vector<1x8x1xf32>
    %63 = vector.extract_strided_slice %7 {offsets = [0, 2, 0], sizes = [1, 1, 256], strides = [1, 1, 1]} : vector<1x4x256xf32> to vector<1x1x256xf32>
    %64 = vector.broadcast %62 : vector<1x8x1xf32> to vector<1x8x256xf32>
    %65 = vector.broadcast %63 : vector<1x1x256xf32> to vector<1x8x256xf32>
    %66 = arith.mulf %64, %65 : vector<1x8x256xf32>
    %67 = arith.addf %60, %66 : vector<1x8x256xf32>
    %68 = vector.extract_strided_slice %47 {offsets = [0, 3], sizes = [8, 1], strides = [1, 1]} : vector<8x4xf32> to vector<8x1xf32>
    %69 = vector.shape_cast %68 : vector<8x1xf32> to vector<1x8x1xf32>
    %70 = vector.extract_strided_slice %7 {offsets = [0, 3, 0], sizes = [1, 1, 256], strides = [1, 1, 1]} : vector<1x4x256xf32> to vector<1x1x256xf32>
    %71 = vector.broadcast %69 : vector<1x8x1xf32> to vector<1x8x256xf32>
    %72 = vector.broadcast %70 : vector<1x1x256xf32> to vector<1x8x256xf32>
    %73 = arith.mulf %71, %72 : vector<1x8x256xf32>
    %74 = arith.addf %67, %73 : vector<1x8x256xf32>
    %75 = vector.broadcast %46 : vector<1x8x1xf32> to vector<1x8x256xf32>
    %76 = arith.addf %74, %75 : vector<1x8x256xf32>
    %cst_15 = arith.constant 0.000000e+00 : f32
    %77 = vector.broadcast %cst_15 : f32 to vector<1x8x256xf32>
    %78 = arith.maximumf %76, %77 : vector<1x8x256xf32>
    %c0_16 = arith.constant 0 : index
    %c0_17 = arith.constant 0 : index
    %79 = vector.load %arg5[%c0_16, %c0_17] : memref<4x8xf32, #tpu.memory_space<vmem>>, vector<4x8xf32>
    %80 = vector.extract_strided_slice %79 {offsets = [0, 0], sizes = [4, 1], strides = [1, 1]} : vector<4x8xf32> to vector<4x1xf32>
    %81 = vector.shape_cast %80 : vector<4x1xf32> to vector<1x4x1xf32>
    %82 = vector.extract_strided_slice %78 {offsets = [0, 0, 0], sizes = [1, 1, 256], strides = [1, 1, 1]} : vector<1x8x256xf32> to vector<1x1x256xf32>
    %83 = vector.broadcast %81 : vector<1x4x1xf32> to vector<1x4x256xf32>
    %84 = vector.broadcast %82 : vector<1x1x256xf32> to vector<1x4x256xf32>
    %85 = arith.mulf %83, %84 : vector<1x4x256xf32>
    %86 = vector.extract_strided_slice %79 {offsets = [0, 1], sizes = [4, 1], strides = [1, 1]} : vector<4x8xf32> to vector<4x1xf32>
    %87 = vector.shape_cast %86 : vector<4x1xf32> to vector<1x4x1xf32>
    %88 = vector.extract_strided_slice %78 {offsets = [0, 1, 0], sizes = [1, 1, 256], strides = [1, 1, 1]} : vector<1x8x256xf32> to vector<1x1x256xf32>
    %89 = vector.broadcast %87 : vector<1x4x1xf32> to vector<1x4x256xf32>
    %90 = vector.broadcast %88 : vector<1x1x256xf32> to vector<1x4x256xf32>
    %91 = arith.mulf %89, %90 : vector<1x4x256xf32>
    %92 = arith.addf %85, %91 : vector<1x4x256xf32>
    %93 = vector.extract_strided_slice %79 {offsets = [0, 2], sizes = [4, 1], strides = [1, 1]} : vector<4x8xf32> to vector<4x1xf32>
    %94 = vector.shape_cast %93 : vector<4x1xf32> to vector<1x4x1xf32>
    %95 = vector.extract_strided_slice %78 {offsets = [0, 2, 0], sizes = [1, 1, 256], strides = [1, 1, 1]} : vector<1x8x256xf32> to vector<1x1x256xf32>
    %96 = vector.broadcast %94 : vector<1x4x1xf32> to vector<1x4x256xf32>
    %97 = vector.broadcast %95 : vector<1x1x256xf32> to vector<1x4x256xf32>
    %98 = arith.mulf %96, %97 : vector<1x4x256xf32>
    %99 = arith.addf %92, %98 : vector<1x4x256xf32>
    %100 = vector.extract_strided_slice %79 {offsets = [0, 3], sizes = [4, 1], strides = [1, 1]} : vector<4x8xf32> to vector<4x1xf32>
    %101 = vector.shape_cast %100 : vector<4x1xf32> to vector<1x4x1xf32>
    %102 = vector.extract_strided_slice %78 {offsets = [0, 3, 0], sizes = [1, 1, 256], strides = [1, 1, 1]} : vector<1x8x256xf32> to vector<1x1x256xf32>
    %103 = vector.broadcast %101 : vector<1x4x1xf32> to vector<1x4x256xf32>
    %104 = vector.broadcast %102 : vector<1x1x256xf32> to vector<1x4x256xf32>
    %105 = arith.mulf %103, %104 : vector<1x4x256xf32>
    %106 = arith.addf %99, %105 : vector<1x4x256xf32>
    %107 = vector.extract_strided_slice %79 {offsets = [0, 4], sizes = [4, 1], strides = [1, 1]} : vector<4x8xf32> to vector<4x1xf32>
    %108 = vector.shape_cast %107 : vector<4x1xf32> to vector<1x4x1xf32>
    %109 = vector.extract_strided_slice %78 {offsets = [0, 4, 0], sizes = [1, 1, 256], strides = [1, 1, 1]} : vector<1x8x256xf32> to vector<1x1x256xf32>
    %110 = vector.broadcast %108 : vector<1x4x1xf32> to vector<1x4x256xf32>
    %111 = vector.broadcast %109 : vector<1x1x256xf32> to vector<1x4x256xf32>
    %112 = arith.mulf %110, %111 : vector<1x4x256xf32>
    %113 = arith.addf %106, %112 : vector<1x4x256xf32>
    %114 = vector.extract_strided_slice %79 {offsets = [0, 5], sizes = [4, 1], strides = [1, 1]} : vector<4x8xf32> to vector<4x1xf32>
    %115 = vector.shape_cast %114 : vector<4x1xf32> to vector<1x4x1xf32>
    %116 = vector.extract_strided_slice %78 {offsets = [0, 5, 0], sizes = [1, 1, 256], strides = [1, 1, 1]} : vector<1x8x256xf32> to vector<1x1x256xf32>
    %117 = vector.broadcast %115 : vector<1x4x1xf32> to vector<1x4x256xf32>
    %118 = vector.broadcast %116 : vector<1x1x256xf32> to vector<1x4x256xf32>
    %119 = arith.mulf %117, %118 : vector<1x4x256xf32>
    %120 = arith.addf %113, %119 : vector<1x4x256xf32>
    %121 = vector.extract_strided_slice %79 {offsets = [0, 6], sizes = [4, 1], strides = [1, 1]} : vector<4x8xf32> to vector<4x1xf32>
    %122 = vector.shape_cast %121 : vector<4x1xf32> to vector<1x4x1xf32>
    %123 = vector.extract_strided_slice %78 {offsets = [0, 6, 0], sizes = [1, 1, 256], strides = [1, 1, 1]} : vector<1x8x256xf32> to vector<1x1x256xf32>
    %124 = vector.broadcast %122 : vector<1x4x1xf32> to vector<1x4x256xf32>
    %125 = vector.broadcast %123 : vector<1x1x256xf32> to vector<1x4x256xf32>
    %126 = arith.mulf %124, %125 : vector<1x4x256xf32>
    %127 = arith.addf %120, %126 : vector<1x4x256xf32>
    %128 = vector.extract_strided_slice %79 {offsets = [0, 7], sizes = [4, 1], strides = [1, 1]} : vector<4x8xf32> to vector<4x1xf32>
    %129 = vector.shape_cast %128 : vector<4x1xf32> to vector<1x4x1xf32>
    %130 = vector.extract_strided_slice %78 {offsets = [0, 7, 0], sizes = [1, 1, 256], strides = [1, 1, 1]} : vector<1x8x256xf32> to vector<1x1x256xf32>
    %131 = vector.broadcast %129 : vector<1x4x1xf32> to vector<1x4x256xf32>
    %132 = vector.broadcast %130 : vector<1x1x256xf32> to vector<1x4x256xf32>
    %133 = arith.mulf %131, %132 : vector<1x4x256xf32>
    %134 = arith.addf %127, %133 : vector<1x4x256xf32>
    %c0_18 = arith.constant 0 : index
    %c0_19 = arith.constant 0 : index
    %135 = vector.load %arg6[%c0_18, %c0_19] : memref<4x1xf32, #tpu.memory_space<vmem>>, vector<4x1xf32>
    %136 = vector.shape_cast %135 : vector<4x1xf32> to vector<1x4x1xf32>
    %137 = vector.broadcast %136 : vector<1x4x1xf32> to vector<1x4x256xf32>
    %138 = arith.addf %134, %137 : vector<1x4x256xf32>
    %139 = arith.negf %138 : vector<1x4x256xf32>
    %140 = math.exp %139 : vector<1x4x256xf32>
    %cst_20 = arith.constant 1.000000e+00 : f32
    %141 = vector.broadcast %cst_20 : f32 to vector<1x4x256xf32>
    %142 = arith.addf %141, %140 : vector<1x4x256xf32>
    %143 = arith.divf %141, %142 : vector<1x4x256xf32>
    %c0_21 = arith.constant 0 : index
    %c0_22 = arith.constant 0 : index
    %c0_23 = arith.constant 0 : index
    %c0_24 = arith.constant 0 : index
    %144 = vector.load %arg1[%c0_21, %c0_22, %c0_23, %c0_24] : memref<2x1x4x256xf32, #tpu.memory_space<vmem>>, vector<1x1x4x256xf32>
    %145 = vector.shape_cast %144 : vector<1x1x4x256xf32> to vector<1x4x256xf32>
    %146 = arith.mulf %145, %143 : vector<1x4x256xf32>
    %c0_25 = arith.constant 0 : index
    %c0_26 = arith.constant 0 : index
    %c0_27 = arith.constant 0 : index
    %c0_28 = arith.constant 0 : index
    %147 = vector.load %arg7[%c0_25, %c0_26, %c0_27, %c0_28] : memref<2x1x4x256xf32, #tpu.memory_space<vmem>>, vector<1x1x4x256xf32>
    %148 = vector.shape_cast %147 : vector<1x1x4x256xf32> to vector<1x4x256xf32>
    %149 = vector.shape_cast %146 : vector<1x4x256xf32> to vector<1x1x4x256xf32>
    tpu.vector_store %arg7[%c0_25, %c0_26, %c0_27, %c0_28], %149 {strides = array<i32>} : memref<2x1x4x256xf32, #tpu.memory_space<vmem>>, vector<1x1x4x256xf32>,
    %c1_29 = arith.constant 1 : index
    %c0_30 = arith.constant 0 : index
    %c0_31 = arith.constant 0 : index
    %c0_32 = arith.constant 0 : index
    %150 = vector.load %arg1[%c1_29, %c0_30, %c0_31, %c0_32] : memref<2x1x4x256xf32, #tpu.memory_space<vmem>>, vector<1x1x4x256xf32>
    %151 = vector.shape_cast %150 : vector<1x1x4x256xf32> to vector<1x4x256xf32>
    %152 = arith.mulf %151, %143 : vector<1x4x256xf32>
    %c1_33 = arith.constant 1 : index
    %c0_34 = arith.constant 0 : index
    %c0_35 = arith.constant 0 : index
    %c0_36 = arith.constant 0 : index
    %153 = vector.load %arg7[%c1_33, %c0_34, %c0_35, %c0_36] : memref<2x1x4x256xf32, #tpu.memory_space<vmem>>, vector<1x1x4x256xf32>
    %154 = vector.shape_cast %153 : vector<1x1x4x256xf32> to vector<1x4x256xf32>
    %155 = vector.shape_cast %152 : vector<1x4x256xf32> to vector<1x1x4x256xf32>
    tpu.vector_store %arg7[%c1_33, %c0_34, %c0_35, %c0_36], %155 {strides = array<i32>} : memref<2x1x4x256xf32, #tpu.memory_space<vmem>>, vector<1x1x4x256xf32>,
    return
  }
  func.func @transform_0(%arg0: i32) -> (i32, i32, i32, i32) {
    %c0_i32 = arith.constant 0 : i32
    %c0_i32_0 = arith.constant 0 : i32
    %c0_i32_1 = arith.constant 0 : i32
    %c0_i32_2 = arith.constant 0 : i32
    return %c0_i32, %arg0, %c0_i32_0, %c0_i32_1 : i32, i32, i32, i32
  }
  func.func @transform_1(%arg0: i32) -> (i32, i32) {
    %c0_i32 = arith.constant 0 : i32
    %c0_i32_0 = arith.constant 0 : i32
    %c0_i32_1 = arith.constant 0 : i32
    return %c0_i32, %c0_i32_0 : i32, i32
  }
  func.func @transform_2(%arg0: i32) -> (i32, i32) {
    %c0_i32 = arith.constant 0 : i32
    %c0_i32_0 = arith.constant 0 : i32
    %c0_i32_1 = arith.constant 0 : i32
    return %c0_i32, %c0_i32_0 : i32, i32
  }
  func.func @transform_3(%arg0: i32) -> (i32, i32) {
    %c0_i32 = arith.constant 0 : i32
    %c0_i32_0 = arith.constant 0 : i32
    %c0_i32_1 = arith.constant 0 : i32
    return %c0_i32, %c0_i32_0 : i32, i32
  }
  func.func @transform_4(%arg0: i32) -> (i32, i32) {
    %c0_i32 = arith.constant 0 : i32
    %c0_i32_0 = arith.constant 0 : i32
    %c0_i32_1 = arith.constant 0 : i32
    return %c0_i32, %c0_i32_0 : i32, i32
  }
  func.func @transform_5(%arg0: i32) -> (i32, i32) {
    %c0_i32 = arith.constant 0 : i32
    %c0_i32_0 = arith.constant 0 : i32
    %c0_i32_1 = arith.constant 0 : i32
    return %c0_i32, %c0_i32_0 : i32, i32
  }
  func.func @transform_6(%arg0: i32) -> (i32, i32, i32, i32) {
    %c0_i32 = arith.constant 0 : i32
    %c0_i32_0 = arith.constant 0 : i32
    %c0_i32_1 = arith.constant 0 : i32
    %c0_i32_2 = arith.constant 0 : i32
    return %c0_i32, %arg0, %c0_i32_0, %c0_i32_1 : i32, i32, i32, i32
  }
}

</mosaic_0001>

<bundles_post_ra>
// kernel: tpu_custom_call.1
= control target key start
LH: loop header
LB: loop body
LE: loop exit
PB: predicated region body
PF: predicated region fallthrough
CT: control target
= control target key end

     0   :  { %11 = vsyncpa [#allocation3], 0  ;;  %s1087_s0 = inlined_call_operand.hbm [shape: f32[2,2,4,256], index: 0, kind: input, shape index: {}]   ;;  %s1088_s1 = inlined_call_operand.vmem [shape: f32[8,4], index: 1, kind: input, shape index: {}]   ;;  %s1089_s2 = inlined_call_operand.vmem [shape: f32[8,4], index: 2, kind: input, shape index: {}]   ;;  %s1090_s3 = inlined_call_operand.vmem [shape: f32[8,1], index: 3, kind: input, shape index: {}]   ;;  %s1091_s4 = inlined_call_operand.vmem [shape: f32[4,8], index: 4, kind: input, shape index: {}]   ;;  %s1092_s5 = inlined_call_operand.vmem [shape: f32[4,1], index: 5, kind: input, shape index: {}]   ;;  %s1093_s6 = inlined_call_operand.hbm [shape: f32[2,2,4,256], index: 6, kind: output, shape index: {}]  }
   0x1   :  { %13 = vsyncpa [#allocation3 + $0x1], 0 }
   0x2   :  { %14 = vsyncpa [#allocation4], 0 }
   0x3   :  { %16 = vsyncpa [#allocation4 + $0x1], 0  ;;  %s920_s21 = smov 0   ;;  %s922_s22 = smov 0  }
   0x4   :  { %s924_s23 = smov 0   ;;  %s926_s24 = smov 0  }
   0x5 LB: > { %s941_s25 = sadd.s32 4294967295, %s865_s24   ;;  %s655_s26 = sadd.s32 4294967294, %s865_s24   ;;  %s865_s24 = sphi %s926_s24, %s1104_s24   ;;  %s861_s23 = sphi %s924_s23, %s1103_s23   ;;  %s857_s22 = sphi %s922_s22, %s1102_s22   ;;  %s853_s21 = sphi %s920_s21, %s1101_s21  }
   0x6   : > { %s945_s27 = sadd.s32 1, %s865_s24   ;;  %s29_s28 = sadd.s32 1, %s861_s23 }
   0x7   : > { %s26_s29 = ssub.s32 %s865_s24, %s945_s27  ;;  %p36_p0 = scmp.ne.s32.totalorder %s861_s23, %s857_s22 }
   0x8   : > { %p27_p1 = scmp.eq.s32.totalorder %s26_s29, 0  ;;  %p37_p2 = scmp.eq.s32.totalorder %s865_s24, 0 }
   0x9   : > { %p42_p3 = scmp.ne.s32.totalorder %s857_s22, %s853_s21  ;;  %p43_p4 = scmp.eq.s32.totalorder %s941_s25, 0 }
   0xa   : > { %s957_s30 = scalar_select %p27_p1, %s861_s23, %s29_s28  }
   0xb   : > { %p959_p5 = por %p37_p2, %p36_p0  ;;  %p963_p6 = por %p43_p4, %p42_p3 }
   0xc   : > { %p171_p7 = scmp.eq.s32.totalorder %s941_s25, 1  ;;  %p177_p8 = scmp.eq.s32.totalorder %s655_s26, 1 }
   0xd   : > { %p657_p9 = scmp.ge.s32.totalorder %s865_s24, 2  ;;  %p688_p10 = scmp.lt.s32.totalorder %s865_s24, 2 }
   0xe   : > { %p970_p11 = por %p171_p7, %p36_p0  ;;  %p974_p12 = por %p177_p8, %p42_p3 }
   0xf   : > { %s212_s11 = sand.u32 1, %s861_s23   ;;  %s674_s12 = sshll.u32 %s865_s24, 3 }
  0x10   : > { %s658_s13 = sshll.u32 %s212_s11, 4  ;;  %s221_s16 = scalar_lea.hbm %s1087_s0, %s674_s12 }
  0x11   : > { %s222_s17 = sshll.u32 %s221_s16, 4  ;;  %s216_s18 = scalar_lea.vmem [#allocation2], %s658_s13  ;;  %s223_s17 = int_to_ptr.hbm [resolvable:$true] %s222_s17 }
  0x12   : > { %s224_s19 = sshll.u32 %s216_s18, 4  ;;  %p985_p13 = pnand %p688_p10, %p959_p5  ;;  %s225_s19 = int_to_ptr.vmem [resolvable:$true] %s224_s19 }
  0x13   : > { %p661_p0 = scmp.ge.s32.totalorder %s865_s24, 1  ;;  %s213_s26 = scalar_lea.sflag [#allocation3], %s212_s11 }
  0x14   : > { %s769_s28 = sshra.s32 %s223_s17, 4  ;;  %p773_p2 = pneg %p985_p13  ;;  %s770_s28 = int_to_ptr.hbm [resolvable:$true] %s769_s28 }
  0x15   : > { %s771_s29 = scalar_lea.hbm %s770_s28, 16  ;;  %s776_s14 = scalar_lea.hbm %s1087_s0, 32 }
  0x16   : > { %p772_p1 = scmp.ne.s32.totalorder %s770_s28, %s771_s29  ;;  %p777_p5 = scmp.lt.s32.totalorder %s770_s28, %s1087_s0 }
  0x17   : > { %p778_p7 = scmp.lt.s32.totalorder %s776_s14, %s771_s29 }
  0x18   : > { %p774_p3 = pnand %p773_p2, %p772_p1 }
  0x19   : > { %p779_p8 = por %p778_p7, %p777_p5 }
  0x1a   : > { %p775_p4 = pneg %p774_p3 }
  0x1c   : > { %p780_p10 = pnand %p779_p8, %p775_p4 }
  0x1e   : > { %783 = shalt.err (!%p780_p10)
}
  0x1f   : > { %s867_s11 = smov 256   ;;  %s868_s16 = smov 128  }
  0x20   : > { %s869_s18 = smov 8   ;;  %p232_p1 = scmp.lt.s32.totalorder %s865_s24, 3 }
  0x21   : > { %683 = dma.hbm_to_vmem [thread:$0]  (!%p985_p13), %s223_s17, 256, %s225_s19, %s213_s26, %s867_s11, %s868_s16, %s869_s18  }
  0x22   : > { %p233_p2 = pnand %p661_p0, %p232_p1 }
  0x23   : > { %s1004_s12 = sand.u32 (!%p233_p2), 1, %s857_s22  }
  0x24   : > { %236 = sbr.rel (%p233_p2) target bundleno = 522 (0x20a), region = 44  ;;  %s662_s28 = sshll.u32 (!%p233_p2), %s1004_s12, 4 }
  0x25   : > { %s239_s29 = scalar_lea.sflag (!%p233_p2), [#allocation3], %s1004_s12  ;;  %s242_s13 = scalar_lea.vmem (!%p233_p2), [#allocation2], %s662_s28 }
  0x29   : > { %844 = dma.done.wait (%p963_p6), %s239_s29, 256  }
  0x2a   : > { %846 = vsyncadd (%p963_p6), %s239_s29, 4294967040  ;;  %v1014_v0 = vld [vmem:[%s242_s13] sm:$0xff]  ;;  %v1017_v1 = vld [vmem:[%s242_s13 + $0x8] sm:$0xff]  ;;  %vm296_vm0 = vcmask 1043456   ;;  %v870_v12 = vmov 256.0   ;;  %s871_s19 = smov 125  }
  0x2b   : > { %291 = vst [vmem:[#allocation1] ss:$2 sm:$0xff] %v1014_v0  ;;  %755 = vrcp.f32 %v870_v12  ;;  %v337_v36 = vld [vmem:[%s1089_s2] sm:$0xff]  ;;  %s872_s20 = smov 127   ;;  %s873_s26 = smov 126   ;;  %v874_v46 = vmov 1  }
  0x2c   : > { %v363_v45 = vld [vmem:[%s1088_s1] sm:$0xff]  ;;  %741 = vset.pattern.permute.xlu0 %v874_v46  ;;  %v875_v47 = vmov 2   ;;  %v876_v48 = vmov 0   ;;  %v877_v50 = vmov 3   ;;  %v878_v51 = vmov 7   ;;  %s675_s8 = sshll.u32 %s941_s25, 3 }
  0x2d   : > { %742 = vset.pattern.permute.xlu1 %v875_v47  ;;  %740 = vset.pattern.permute.xlu2 %v876_v48  ;;  %v429_v49 = vld [vmem:[%s1091_s4] sm:$0xf]  ;;  %v879_v53 = vmov 4   ;;  %v880_v60 = vmov 6   ;;  %v881_v62 = vmov 5   ;;  %s271_s25 = scalar_lea.vmem [#allocation5], %s662_s28 }
  0x2e   : > { %v361_v58 = vld [vmem:[%s1090_s3] sm:$0xff]  ;;  %s567_s7 = scalar_lea.sflag [#allocation4], %s1004_s12  ;;  %s819_s18 = scalar_lea.hbm %s1093_s6, 32 }
  0x2f   : > { %v509_v63 = vld [vmem:[%s1092_s5] sm:$0xf] }
  0x31   : > { %v756_v13 = vpop.eup %755 }
  0x32   : > { %v292_v2 = vld.sshfl [vmem:[#allocation1] sm:$0xff pattern:$0x75316420]  ;;  %v293_v3 = vld.sshfl [vmem:[#allocation1 + $0x8] sm:$0xff pattern:$0x75316420]  ;;  %vm307_vm1 = vweird.f32 %v756_v13 }
  0x33   : > { %v297_v4 = vsel %vm296_vm0, %v292_v2, 0.0  ;;  %v298_v5 = vsel %vm296_vm0, %v293_v3, 0.0  ;;  %311 = vst [vmem:[#allocation1] ss:$2 sm:$0xff] %v1017_v1  ;;  %v303_v14 = vmul.f32 256.0, %v756_v13  ;;  %v276_v2 = vmul.f32 %v1017_v1, %v1017_v1 }
  0x34   : > { %v299_v6 = vadd.f32 %v298_v5, %v297_v4  ;;  %v275_v3 = vmul.f32 %v1014_v0, %v1014_v0 }
  0x35   : > { %v304_v15 = vsub.f32 1.0, %v303_v14 }
  0x36   : > { %300 = vadd.xlane.f32.xlu0 %v299_v6  ;;  %v277_v4 = vadd.f32 %v276_v2, %v275_v3 }
  0x37   : > { %v305_v16 = vmul.f32 %v756_v13, %v304_v15 }
  0x38   : > { %vm285_vm4 = vcmp.eq.f32.partialorder %v277_v4, inf  ;;  %vm287_vm5 = vcmp.eq.f32.partialorder %v277_v4, 0.0 }
  0x39   : > { %v306_v18 = vadd.f32 %v756_v13, %v305_v16 }
  0x3a   : > { %v312_v7 = vld.sshfl [vmem:[#allocation1] sm:$0xff pattern:$0x75316420]  ;;  %v313_v8 = vld.sshfl [vmem:[#allocation1 + $0x8] sm:$0xff pattern:$0x75316420] }
  0x3b   : > { %v316_v9 = vsel %vm296_vm0, %v312_v7, 0.0  ;;  %v317_v10 = vsel %vm296_vm0, %v313_v8, 0.0  ;;  %v308_v19 = vsel %vm307_vm1, %v756_v13, %v306_v18  ;;  %v288_v13 = vand.u32 2147483648, %v277_v4 }
  0x3c   : > { %v318_v11 = vadd.f32 %v317_v10, %v316_v9 }
  0x3e   : > { %319 = vadd.xlane.f32.xlu0 %v318_v11 }
  0x52   : > { %379 = vperm.xlu0 %741, %v363_v45  }
  0x5a   : > { %752 = vset.pattern.permute.xlu0 %v878_v51 }
  0x5b   : > { %500 = vperm.xlu0 %752, %v429_v49  }
  0x63   : > { %754 = vset.pattern.permute.xlu0 %v876_v48 }
  0xa9   : > { %v301_v17 = vpop.xlane.xlu0 %300 }
  0xaa   : > { %v309_v20 = vmul.f32 %v308_v19, %v301_v17 }
  0xac   : > { %v322_v23 = vmul.f32 %v309_v20, %v309_v20 }
  0xb1   : > { %v320_v21 = vpop.xlane.xlu0 %319 }
  0xb2   : > { %v321_v22 = vmul.f32 %v320_v21, %v308_v19 }
  0xb4   : > { %v323_v24 = vmul.f32 %v321_v22, %v321_v22 }
  0xb6   : > { %v324_v25 = vadd.f32 %v323_v24, %v322_v23 }
  0xb8   : > { %757 = vrsqrt.f32 %v324_v25  ;;  %vm332_vm2 = vcmp.eq.f32.partialorder %v324_v25, inf  ;;  %v335_v33 = vand.u32 2147483648, %v324_v25  ;;  %vm334_vm3 = vcmp.eq.f32.partialorder %v324_v25, 0.0 }
  0xb9   : > { %759 = vrsqrt.f32 %v277_v4 }
  0xbe   : > { %v758_v26 = vpop.eup %757 }
  0xbf   : > { %v326_v27 = vmul.f32 %v758_v26, %v324_v25  ;;  %v760_v5 = vpop.eup %759 }
  0xc0   : > { %v279_v6 = vmul.f32 %v760_v5, %v277_v4 }
  0xc1   : > { %v327_v28 = vmul.f32 %v758_v26, %v326_v27 }
  0xc2   : > { %v280_v7 = vmul.f32 %v760_v5, %v279_v6 }
  0xc3   : > { %v328_v29 = vmul.f32 0.5, %v327_v28 }
  0xc4   : > { %v281_v8 = vmul.f32 0.5, %v280_v7  ;;  %v380_v28 = vpop.permute.xlu0 %379 }
  0xc5   : > { %v329_v30 = vsub.f32 1.5, %v328_v29 }
  0xc6   : > { %v282_v9 = vsub.f32 1.5, %v281_v8 }
  0xc7   : > { %v330_v31 = vmul.f32 %v758_v26, %v329_v30 }
  0xc8   : > { %v283_v10 = vmul.f32 %v760_v5, %v282_v9 }
  0xc9   : > { %v331_v32 = vmul.f32 %v330_v31, %v324_v25 }
  0xca   : > { %v284_v12 = vmul.f32 %v283_v10, %v277_v4 }
  0xcb   : > { %v333_v34 = vsel %vm332_vm2, %v324_v25, %v331_v32 }
  0xcc   : > { %v336_v35 = vsel %vm334_vm3, %v335_v33, %v333_v34  ;;  %v286_v14 = vsel %vm285_vm4, %v277_v4, %v284_v12 }
  0xcd   : > { %v354_v37 = vperm.slane %v336_v35, 3  ;;  %v340_v38 = vperm.slane %v336_v35, 1  ;;  %v338_v39 = vperm.slane %v336_v35, 0  ;;  %v347_v43 = vperm.slane %v336_v35, 2 }
  0xce   : > { %v289_v15 = vsel %vm287_vm5, %v288_v13, %v286_v14 }
  0xcf   : > { %v355_v40 = vmul.f32 %v354_v37, %v337_v36  ;;  %v341_v41 = vmul.f32 %v340_v38, %v337_v36  ;;  %v339_v42 = vmul.f32 %v338_v39, %v337_v36  ;;  %v348_v44 = vmul.f32 %v347_v43, %v337_v36 }
  0xd0   : > { %v370_v17 = vperm.slane %v289_v15, 0  ;;  %v371_v18 = vperm.slane %v289_v15, 4  ;;  %v382_v19 = vperm.slane %v289_v15, 1  ;;  %v383_v20 = vperm.slane %v289_v15, 5 }
  0xd1   : > { %357 = vrot.lane.b32.xlu2 %v355_v40, %s871_s19  ;;  %343 = vrot.lane.b32.xlu1 %v341_v41, %s872_s20  ;;  %v396_v22 = vperm.slane %v289_v15, 2  ;;  %v397_v23 = vperm.slane %v289_v15, 6  ;;  %v410_v29 = vperm.slane %v289_v15, 3  ;;  %v411_v30 = vperm.slane %v289_v15, 7  ;;  %s578_s20 = scalar_lea.hbm %s1093_s6, %s675_s8 }
  0xd2   : > { %v374_v24 = vperm.slane %v370_v17, 0  ;;  %v375_v25 = vperm.slane %v371_v18, 0  ;;  %v386_v26 = vperm.slane %v382_v19, 1  ;;  %v387_v27 = vperm.slane %v383_v20, 1  ;;  %s581_s14 = sshll.u32 %s578_s20, 4  ;;  %s582_s14 = int_to_ptr.hbm [resolvable:$true] %s581_s14 }
  0xd3   : > { %v400_v31 = vperm.slane %v396_v22, 2  ;;  %v401_v32 = vperm.slane %v397_v23, 2  ;;  %v414_v38 = vperm.slane %v410_v29, 3  ;;  %v415_v39 = vperm.slane %v411_v30, 3  ;;  %s813_s15 = sshra.s32 %s582_s14, 4  ;;  %s814_s15 = int_to_ptr.hbm [resolvable:$true] %s813_s15 }
  0xd4   : > { %v388_v35 = vmul.f32 %v386_v26, %v380_v28  ;;  %v389_v36 = vmul.f32 %v387_v27, %v380_v28  ;;  %s815_s28 = scalar_lea.hbm %s814_s15, 16  ;;  %p820_p3 = scmp.lt.s32.totalorder %s814_s15, %s1093_s6 }
  0xd5   : > { %p816_p6 = scmp.ne.s32.totalorder %s814_s15, %s815_s28  ;;  %p821_p4 = scmp.lt.s32.totalorder %s819_s18, %s815_s28 }
  0xd7   : > { %p817_p13 = pnand %p816_p6, %p970_p11  ;;  %p822_p5 = por %p821_p4, %p820_p3 }
  0xd9   : > { %350 = vrot.lane.b32.xlu1 %v348_v44, %s873_s26  ;;  %366 = vperm.xlu2 %740, %v363_v45   ;;  %s579_s26 = sshll.u32 %s271_s25, 4  ;;  %p818_p0 = pneg %p817_p13  ;;  %s580_s26 = int_to_ptr.vmem [resolvable:$true] %s579_s26 }
  0xdb   : > { %p823_p7 = pnand %p822_p5, %p818_p0 }
  0xe1   : > { %393 = vperm.xlu1 %742, %v363_v45   ;;  %743 = vset.pattern.permute.xlu2 %v877_v50 }
  0xe2   : > { %407 = vperm.xlu2 %743, %v363_v45  }
  0xe9   : > { %745 = vset.pattern.permute.xlu1 %v874_v46 }
  0xea   : > { %440 = vperm.xlu1 %745, %v429_v49   ;;  %744 = vset.pattern.permute.xlu2 %v876_v48 }
  0xeb   : > { %432 = vperm.xlu2 %744, %v429_v49  }
  0xf2   : > { %747 = vset.pattern.permute.xlu1 %v876_v48 }
  0xf3   : > { %746 = vset.pattern.permute.xlu2 %v875_v47 }
  0xf4   : > { %450 = vperm.xlu2 %746, %v429_v49  }
  0xfc   : > { %749 = vset.pattern.permute.xlu2 %v879_v53 }
  0xfd   : > { %470 = vperm.xlu2 %749, %v429_v49  }
 0x105   : > { %751 = vset.pattern.permute.xlu2 %v880_v60 }
 0x106   : > { %490 = vperm.xlu2 %751, %v429_v49  }
 0x12b   : > { %v358_v57 = vpop.permute.xlu2 %357 }
 0x133   : > { %v367_v11 = vpop.permute.xlu2 %366 }
 0x134   : > { %v376_v33 = vmul.f32 %v374_v24, %v367_v11  ;;  %v377_v34 = vmul.f32 %v375_v25, %v367_v11 }
 0x136   : > { %v390_v41 = vadd.f32 %v388_v35, %v376_v33  ;;  %v501_v35 = vpop.permute.xlu0 %500 }
 0x13c   : > { %v408_v16 = vpop.permute.xlu2 %407 }
 0x13d   : > { %v416_v45 = vmul.f32 %v414_v38, %v408_v16  ;;  %v417_v46 = vmul.f32 %v415_v39, %v408_v16 }
 0x143   : > { %v344_v52 = vpop.permute.xlu1 %343 }
 0x144   : > { %v346_v54 = vadd.f32 %v344_v52, %v339_v42  ;;  %v391_v42 = vadd.f32 %v389_v36, %v377_v34 }
 0x145   : > { %v433_v37 = vpop.permute.xlu2 %432 }
 0x14b   : > { %v351_v55 = vpop.permute.xlu1 %350 }
 0x14c   : > { %v353_v56 = vadd.f32 %v351_v55, %v346_v54 }
 0x14e   : > { %v360_v59 = vadd.f32 %v358_v57, %v353_v56 }
 0x150   : > { %v362_v61 = vadd.f32 %v361_v58, %v360_v59 }
 0x152   : > { %422 = vperm.xlu1 %747, %v362_v61  }
 0x153   : > { %v394_v21 = vpop.permute.xlu1 %393 }
 0x154   : > { %v402_v43 = vmul.f32 %v400_v31, %v394_v21  ;;  %v403_v44 = vmul.f32 %v401_v32, %v394_v21 }
 0x156   : > { %v404_v47 = vadd.f32 %v402_v43, %v390_v41 }
 0x15a   : > { %748 = vset.pattern.permute.xlu1 %v877_v50  ;;  %v418_v50 = vadd.f32 %v416_v45, %v404_v47 }
 0x15b   : > { %460 = vperm.xlu1 %748, %v429_v49  }
 0x15c   : > { %v441_v40 = vpop.permute.xlu1 %440 }
 0x163   : > { %750 = vset.pattern.permute.xlu1 %v881_v62 }
 0x164   : > { %480 = vperm.xlu1 %750, %v429_v49   ;;  %v451_v49 = vpop.permute.xlu2 %450 }
 0x16c   : > { %753 = vset.pattern.permute.xlu1 %v876_v48  ;;  %v405_v48 = vadd.f32 %v403_v44, %v391_v42  ;;  %v471_v61 = vpop.permute.xlu2 %470 }
 0x16d   : > { %512 = vperm.xlu1 %753, %v509_v63  }
 0x16e   : > { %v419_v51 = vadd.f32 %v417_v46, %v405_v48 }
 0x174   : > { %v491_v27 = vpop.permute.xlu2 %490 }
 0x1c4   : > { %v423_v52 = vpop.permute.xlu1 %422 }
 0x1c5   : > { %v425_v53 = vadd.f32 %v423_v52, %v418_v50  ;;  %v426_v54 = vadd.f32 %v423_v52, %v419_v51 }
 0x1c7   : > { %v427_v55 = vmax.f32 %v425_v53, 0.0  ;;  %v428_v56 = vmax.f32 %v426_v54, 0.0 }
 0x1c9   : > { %v435_v57 = vperm.slane %v427_v55, 0  ;;  %v436_v58 = vperm.slane %v428_v56, 0  ;;  %v443_v59 = vperm.slane %v427_v55, 1  ;;  %v444_v60 = vperm.slane %v428_v56, 1 }
 0x1ca   : > { %v453_v5 = vperm.slane %v427_v55, 2  ;;  %v454_v6 = vperm.slane %v428_v56, 2  ;;  %v463_v7 = vperm.slane %v427_v55, 3  ;;  %v464_v8 = vperm.slane %v428_v56, 3 }
 0x1cb   : > { %v437_v62 = vmul.f32 %v435_v57, %v433_v37  ;;  %v438_v63 = vmul.f32 %v436_v58, %v433_v37  ;;  %v445_v2 = vmul.f32 %v443_v59, %v441_v40  ;;  %v446_v3 = vmul.f32 %v444_v60, %v441_v40 }
 0x1cc   : > { %v455_v11 = vmul.f32 %v453_v5, %v451_v49  ;;  %v456_v12 = vmul.f32 %v454_v6, %v451_v49  ;;  %v473_v17 = vperm.slane %v427_v55, 4  ;;  %v474_v18 = vperm.slane %v428_v56, 4 }
 0x1cd   : > { %v461_v4 = vpop.permute.xlu1 %460  ;;  %v447_v9 = vadd.f32 %v445_v2, %v437_v62  ;;  %v448_v10 = vadd.f32 %v446_v3, %v438_v63  ;;  %v493_v21 = vperm.slane %v427_v55, 6  ;;  %v494_v22 = vperm.slane %v428_v56, 6 }
 0x1ce   : > { %v465_v13 = vmul.f32 %v463_v7, %v461_v4  ;;  %v466_v14 = vmul.f32 %v464_v8, %v461_v4  ;;  %v475_v23 = vmul.f32 %v473_v17, %v471_v61  ;;  %v476_v24 = vmul.f32 %v474_v18, %v471_v61 }
 0x1cf   : > { %v457_v15 = vadd.f32 %v455_v11, %v447_v9  ;;  %v458_v16 = vadd.f32 %v456_v12, %v448_v10  ;;  %v483_v25 = vperm.slane %v427_v55, 5  ;;  %v484_v26 = vperm.slane %v428_v56, 5 }
 0x1d0   : > { %v503_v28 = vperm.slane %v427_v55, 7  ;;  %v504_v29 = vperm.slane %v428_v56, 7  ;;  %v495_v36 = vmul.f32 %v493_v21, %v491_v27  ;;  %v496_v37 = vmul.f32 %v494_v22, %v491_v27 }
 0x1d1   : > { %v467_v19 = vadd.f32 %v465_v13, %v457_v15  ;;  %v468_v20 = vadd.f32 %v466_v14, %v458_v16 }
 0x1d2   : > { %v505_v40 = vmul.f32 %v503_v28, %v501_v35  ;;  %v506_v41 = vmul.f32 %v504_v29, %v501_v35 }
 0x1d3   : > { %v477_v31 = vadd.f32 %v475_v23, %v467_v19  ;;  %v478_v32 = vadd.f32 %v476_v24, %v468_v20 }
 0x1d6   : > { %v481_v30 = vpop.permute.xlu1 %480 }
 0x1d7   : > { %v485_v33 = vmul.f32 %v483_v25, %v481_v30  ;;  %v486_v34 = vmul.f32 %v484_v26, %v481_v30 }
 0x1d9   : > { %v487_v38 = vadd.f32 %v485_v33, %v477_v31  ;;  %v488_v39 = vadd.f32 %v486_v34, %v478_v32 }
 0x1db   : > { %v497_v42 = vadd.f32 %v495_v36, %v487_v38  ;;  %v498_v43 = vadd.f32 %v496_v37, %v488_v39 }
 0x1dd   : > { %v507_v44 = vadd.f32 %v505_v40, %v497_v42  ;;  %v508_v45 = vadd.f32 %v506_v41, %v498_v43 }
 0x1df   : > { %v513_v46 = vpop.permute.xlu1 %512 }
 0x1e0   : > { %v515_v47 = vadd.f32 %v513_v46, %v507_v44  ;;  %v516_v48 = vadd.f32 %v513_v46, %v508_v45 }
 0x1e2   : > { %v665_v49 = vmul.f32 -1.442695, %v515_v47  ;;  %v666_v50 = vmul.f32 -1.442695, %v516_v48 }
 0x1e4   : > { %761 = vpow2.f32 %v665_v49 }
 0x1e5   : > { %763 = vpow2.f32 %v666_v50 }
 0x1ea   : > { %v762_v51 = vpop.eup %761 }
 0x1eb   : > { %v764_v52 = vpop.eup %763  ;;  %v523_v53 = vadd.f32 1.0, %v762_v51 }
 0x1ec   : > { %v524_v54 = vadd.f32 1.0, %v764_v52 }
 0x1ed   : > { %765 = vrcp.f32 %v523_v53  ;;  %vm530_vm8 = vweird.f32 %v523_v53  ;;  %v536_v4 = vand.u32 2147483648, %v523_v53  ;;  %v534_v6 = vand.u32 2147483647, %v523_v53 }
 0x1ee   : > { %767 = vrcp.f32 %v524_v54  ;;  %v551_v62 = vand.u32 2147483648, %v524_v54  ;;  %v549_v2 = vand.u32 2147483647, %v524_v54  ;;  %vm545_vm10 = vweird.f32 %v524_v54 }
 0x1ef   : > { %v537_v11 = vor.u32 1.1754944e-38, %v536_v4  ;;  %vm535_vm13 = vcmp.eq.f32.partialorder %v534_v6, 8.507059e+37 }
 0x1f0   : > { %v552_v8 = vor.u32 1.1754944e-38, %v551_v62  ;;  %vm550_vm12 = vcmp.eq.f32.partialorder %v549_v2, 8.507059e+37 }
 0x1f3   : > { %v766_v55 = vpop.eup %765 }
 0x1f4   : > { %v768_v56 = vpop.eup %767  ;;  %v526_v57 = vmul.f32 %v766_v55, %v523_v53  ;;  %vm531_vm6 = vweird.f32 %v766_v55 }
 0x1f5   : > { %v541_v58 = vmul.f32 %v768_v56, %v524_v54  ;;  %vm546_vm7 = vweird.f32 %v768_v56  ;;  %vm1044_vm9 = vmor %vm530_vm8, %vm531_vm6 }
 0x1f6   : > { %v527_v59 = vsub.f32 1.0, %v526_v57  ;;  %vm547_vm11 = vmor %vm545_vm10, %vm546_vm7 }
 0x1f7   : > { %v542_v60 = vsub.f32 1.0, %v541_v58 }
 0x1f8   : > { %v528_v61 = vmul.f32 %v766_v55, %v527_v59 }
 0x1f9   : > { %v543_v63 = vmul.f32 %v768_v56, %v542_v60 }
 0x1fa   : > { %v529_v3 = vadd.f32 %v766_v55, %v528_v61 }
 0x1fb   : > { %v544_v7 = vadd.f32 %v768_v56, %v543_v63 }
 0x1fc   : > { %v533_v9 = vsel %vm1044_vm9, %v766_v55, %v529_v3 }
 0x1fd   : > { %v548_v10 = vsel %vm547_vm11, %v768_v56, %v544_v7  ;;  %v538_v14 = vsel %vm535_vm13, %v537_v11, %v533_v9 }
 0x1fe   : > { %v553_v12 = vsel %vm550_vm12, %v552_v8, %v548_v10 }
 0x1ff   : > { %v557_v13 = vrot.slane %v553_v12, 4 }
 0x201   : > { %v558_v15 = vsel %vm296_vm0, %v538_v14, %v557_v13 }
 0x202   : > { %v560_v16 = vmul.f32 %v558_v15, %v1014_v0  ;;  %v563_v17 = vmul.f32 %v1017_v1, %v558_v15 }
 0x204   : > { %561 = vst [vmem:[%s271_s25] sm:$0xff] %v560_v16 }
 0x205   : > { %668 = vst [vmem:[%s271_s25 + $0x8] sm:$0xff] %v563_v17 }
 0x206   : > { %826 = shalt.err (!%p823_p7)
}
 0x207   : > { %s882_s12 = smov 128   ;;  %s883_s8 = smov 256  }
 0x208   : > { %s884_s17 = smov 8  }
 0x209   : > { %678 = dma.vmem_to_hbm [thread:$0]  (%p970_p11), %s580_s26, 256, %s582_s14, %s567_s7, %s882_s12, %s883_s8, %s884_s17  }
 0x20a PF: > { %s596_s19 = sand.u32 1, %s853_s21   ;;  %p685_p8 = pnand %p657_p9, %p974_p12 }
 0x20b   : > { %s597_s20 = scalar_lea.sflag [#allocation4], %s596_s19 }
 0x20c   : > { %p686_p10 = pneg %p685_p8 }
 0x20e   : > { %848 = dma.done.wait (%p686_p10), %s597_s20, 256  }
 0x20f   : > { %850 = vsyncadd (%p686_p10), %s597_s20, 4294967040  ;;  %p19_p1 = scmp.ge.s32.totalorder %s945_s27, 4   ;;  %s1101_s21 = smov %s857_s22 }
 0x210   : > { %s1102_s22 = smov %s861_s23  ;;  %s1103_s23 = smov %s957_s30 }
 0x211   : > { %s1104_s24 = smov %s945_s27  ;;  %21 = sbr.rel (!%p19_p1) target bundleno = 5 (0x5), region = 91 }
 0x216   :  { %603 = vsyncpa [#allocation3], 1 }
 0x217   :  { %605 = vsyncpa [#allocation3 + $0x1], 1 }
 0x218   :  { %606 = vsyncpa [#allocation4], 1 }
 0x219   :  { %608 = vsyncpa [#allocation4 + $0x1], 1 }

</bundles_post_ra>
